<compile_context>
chip_gen: v5e
topology: v5e:2x2
jax: 0.10.0
libtpu: 0.0.40
codegen_flags: <defaults>
</compile_context>

<pallas_src>
import functools

import jax
import jax.numpy as jnp
from jax import lax
from jax.experimental import pallas as pl
from jax.experimental.pallas import tpu as pltpu


def _round_up(n, k):
    return ((n + k - 1) // k) * k


def _resnn_kernel(xT_ref, w0_ref, b0_ref, ws_ref, bs_ref, o_ref,
                  *, nTh, h, chunk, n_chunks):
    """One batch tile of the ResNN forward.

    xT_ref : (d+1, TILE_N)   transposed input tile (batch on the lane axis)
    w0_ref : (m, d+1)        opening weight, PyTorch (out, in) layout
    b0_ref : (m, 1)
    ws_ref : (nTh-1, m, m)   residual weights, PyTorch (out, in) layout
    bs_ref : (nTh-1, m, 1)
    o_ref  : (TILE_N, m)     output tile in the module's natural layout
    """
    # Weights/biases are tiny (~10 KiB); hoist the loads out of the chunk loop.
    w0 = w0_ref[...]                                   # (m, d+1)
    b0 = b0_ref[...]                                   # (m, 1)
    ws = [ws_ref[i] for i in range(nTh - 1)]           # each (m, m)
    bs = [bs_ref[i] for i in range(nTh - 1)]           # each (m, 1)

    def chunk_body(c, carry):
        col = pl.multiple_of(c * chunk, chunk)
        xc = xT_ref[:, pl.ds(col, chunk)]              # (d+1, chunk), lane-dense

        # Opening layer in transposed layout: u^T = tanh(W0 @ x^T + b0)
        uT = jnp.tanh(
            jnp.dot(w0, xc, preferred_element_type=jnp.float32) + b0)

        # Residual layers (nTh small & static -> unrolled over layers):
        #   u^T = u^T + h * tanh(Wi @ u^T + bi)
        for i in range(nTh - 1):
            z = jnp.dot(ws[i], uT, preferred_element_type=jnp.float32) + bs[i]
            uT = uT + h * jnp.tanh(z)

        # Store in the module's natural (rows, m) layout.  The XLU transpose
        # and the 32-of-128-lane masked store are free filler under the
        # EUP(tanh) slot; this removes the external XLA output transpose.
        o_ref[pl.ds(col, chunk), :] = uT.T.astype(o_ref.dtype)
        return carry

    # lax.fori_loop bounds live vector state to ~one chunk (+small unroll),
    # guaranteeing a streaming schedule without register spills at large tiles.
    unroll = True if n_chunks <= 2 else 2
    lax.fori_loop(0, n_chunks, chunk_body, None, unroll=unroll)


def prepare_resnn_params(w0, b0, ws, bs):
    """One-time parameter glue (call at parameter-load time, not per forward).

    Keeps the PyTorch (out, in) weight layout unchanged (the transposed-layout
    kernel needs exactly that); only reshapes biases into column vectors.
    """
    m = w0.shape[0]
    nres = ws.shape[0]
    return (
        jnp.asarray(w0, jnp.float32),                       # (m, d+1)
        jnp.asarray(b0, jnp.float32).reshape(m, 1),         # (m, 1)
        jnp.asarray(ws, jnp.float32),                       # (nTh-1, m, m)
        jnp.asarray(bs, jnp.float32).reshape(nres, m, 1),   # (nTh-1, m, 1)
    )


def resnn_forward(x, params, *, nTh, tile_n=4096, chunk_n=256):
    """ResNN forward. Returns (nex, m), matching the PyTorch module.

    x      : (nex, d+1) float32
    params : output of prepare_resnn_params
    """
    assert nTh >= 2, "nTh must be an integer >= 2 (matches the PyTorch module)"
    assert tile_n % 128 == 0, "tile_n must be a multiple of 128 (lane width)"
    assert chunk_n % 128 == 0, "chunk_n must be a multiple of 128 (lane width)"
    w0, b0c, ws, bsc = params
    nex, dp1 = x.shape
    m = w0.shape[0]
    h = 1.0 / (nTh - 1)

    # --- grid sizing ------------------------------------------------------
    # Minimum steps so each tile is <= tile_n; bump to >=4 steps when the
    # batch allows (>=128 rows/step) so v7x megacore gets >=2 steps per core.
    g = max(pl.cdiv(nex, tile_n), 1)
    if nex >= 4 * 128:
        g = max(g, 4)
    tile = _round_up(pl.cdiv(nex, g), 128)       # lane-aligned tile
    g = pl.cdiv(nex, tile)                       # rounding may shrink step count
    nex_p = g * tile                             # padding bounded by <128 rows/step

    # In-kernel lane chunking (bounds live vregs); chunk must divide tile.
    chunk = max(128, min(chunk_n, tile))
    while tile % chunk:
        chunk //= 2
    n_chunks = tile // chunk

    # --- input plumbing (tiny: nex x (d+1) floats) -------------------------
    xT = x.T                                     # (d+1, nex)
    if nex_p != nex:
        xT = jnp.pad(xT, ((0, 0), (0, nex_p - nex)))

    cost = pl.CostEstimate(
        flops=2 * nex_p * (dp1 * m + (nTh - 1) * m * m),
        transcendentals=nTh * nex_p * m,
        bytes_accessed=4 * (nex_p * dp1 + nex_p * m
                            + dp1 * m + m + (nTh - 1) * (m * m + m)),
    )

    kernel = functools.partial(_resnn_kernel, nTh=nTh, h=h,
                               chunk=chunk, n_chunks=n_chunks)

    out = pl.pallas_call(
        kernel,
        out_shape=jax.ShapeDtypeStruct((nex_p, m), jnp.float32),
        grid_spec=pltpu.PrefetchScalarGridSpec(
            num_scalar_prefetch=0,
            grid=(g,),
            in_specs=[
                pl.BlockSpec((dp1, tile), lambda i: (0, i)),          # x^T tile (lane-dense)
                pl.BlockSpec((m, dp1), lambda i: (0, 0)),             # W0 (full, constant)
                pl.BlockSpec((m, 1), lambda i: (0, 0)),               # b0
                pl.BlockSpec((nTh - 1, m, m), lambda i: (0, 0, 0)),   # Wi stack
                pl.BlockSpec((nTh - 1, m, 1), lambda i: (0, 0, 0)),   # bi stack
            ],
            out_specs=pl.BlockSpec((tile, m), lambda i: (i, 0)),      # natural layout
        ),
        compiler_params=pltpu.CompilerParams(
            dimension_semantics=("parallel",),   # batch axis shards across TCs on v7x
        ),
        cost_estimate=cost,
    )(xT, w0, b0c, ws, bsc)

    return out if nex_p == nex else out[:nex]


def resnn_reference(x, w0, b0, ws, bs, *, nTh):
    """Pure-JAX reference matching the PyTorch forward."""
    h = 1.0 / (nTh - 1)
    u = jnp.tanh(x @ w0.T + b0)
    for i in range(nTh - 1):
        u = u + h * jnp.tanh(u @ ws[i].T + bs[i])
    return u


if __name__ == "__main__":
    # shapes consistent with the module: d=4 -> input dim d+1=5, m=32, nTh=3
    d, m, nTh = 4, 32, 3

    key = jax.random.PRNGKey(0)
    k_x, k_w0, k_b0, k_w1, k_b1, k_x2 = jax.random.split(key, 6)

    # deterministic parameter init (PyTorch Linear layout: W is (out, in))
    w0 = 0.1 * jax.random.normal(k_w0, (m, d + 1), dtype=jnp.float32)
    b0 = 0.1 * jax.random.normal(k_b0, (m,), dtype=jnp.float32)
    # layers[2:] are deepcopies of layers[1] in the PyTorch module -> identical params
    w1 = 0.1 * jax.random.normal(k_w1, (m, m), dtype=jnp.float32)
    b1 = 0.1 * jax.random.normal(k_b1, (m,), dtype=jnp.float32)
    ws = jnp.tile(w1[None], (nTh - 1, 1, 1))   # (nTh-1, m, m)
    bs = jnp.tile(b1[None], (nTh - 1, 1))      # (nTh-1, m)

    params = prepare_resnn_params(w0, b0, ws, bs)   # one-time glue, hoisted

    # jit the wrapper so pad/transpose/slice fuse around the single custom call
    fwd = jax.jit(functools.partial(resnn_forward, nTh=nTh))

    # case 1: nex = 2048 -> 4 grid steps of 512 rows (2 per TC on v7x), no padding
    nex = 2048
    x = jax.random.normal(k_x, (nex, d + 1), dtype=jnp.float32)
    out = jax.block_until_ready(fwd(x, params))
    ref = resnn_reference(x, w0, b0, ws, bs, nTh=nTh)
    assert out.shape == (nex, m)
    assert jnp.allclose(out, ref, atol=1e-5, rtol=1e-5), "mismatch vs reference (case 1)"

    # case 2: ragged nex -> one 256-row tile, <128 rows of padding sliced off
    nex2 = 200
    x2 = jax.random.normal(k_x2, (nex2, d + 1), dtype=jnp.float32)
    out2 = jax.block_until_ready(fwd(x2, params))
    ref2 = resnn_reference(x2, w0, b0, ws, bs, nTh=nTh)
    assert out2.shape == (nex2, m)
    assert jnp.allclose(out2, ref2, atol=1e-5, rtol=1e-5), "mismatch vs reference (case 2)"

    print("KERNEL_OK")
</pallas_src>

<mosaic_0001>
module attributes {stable_mosaic.version = 11 : i64} {
  func.func @_resnn_kernel(%arg0: i32, %arg1: memref<5x512xf32, #tpu.memory_space<vmem>>, %arg2: memref<32x5xf32, #tpu.memory_space<vmem>>, %arg3: memref<32x1xf32, #tpu.memory_space<vmem>>, %arg4: memref<2x32x32xf32, #tpu.memory_space<vmem>>, %arg5: memref<2x32x1xf32, #tpu.memory_space<vmem>>, %arg6: memref<512x32xf32, #tpu.memory_space<vmem>>) attributes {dimension_semantics = [#tpu.dimension_semantics<parallel>], iteration_bounds = array<i64: 4>, scalar_prefetch = 0 : i64, scratch_operands = 0 : i64, tpu.core_type = #tpu.core_type<tc>, window_params = [{transform_indices = @transform_0, window_bounds = array<i64: 5, 512>}, {pipeline_mode = #tpu.pipeline_mode<synchronous>, transform_indices = @transform_1, window_bounds = array<i64: 32, 5>}, {pipeline_mode = #tpu.pipeline_mode<synchronous>, transform_indices = @transform_2, window_bounds = array<i64: 32, 1>}, {pipeline_mode = #tpu.pipeline_mode<synchronous>, transform_indices = @transform_3, window_bounds = array<i64: 2, 32, 32>}, {pipeline_mode = #tpu.pipeline_mode<synchronous>, transform_indices = @transform_4, window_bounds = array<i64: 2, 32, 1>}, {transform_indices = @transform_5, window_bounds = array<i64: 512, 32>}]} {
    %c0 = arith.constant 0 : index
    %c0_0 = arith.constant 0 : index
    %0 = vector.load %arg2[%c0, %c0_0] : memref<32x5xf32, #tpu.memory_space<vmem>>, vector<32x5xf32>
    %c0_1 = arith.constant 0 : index
    %c0_2 = arith.constant 0 : index
    %1 = vector.load %arg3[%c0_1, %c0_2] : memref<32x1xf32, #tpu.memory_space<vmem>>, vector<32x1xf32>
    %c0_3 = arith.constant 0 : index
    %c0_4 = arith.constant 0 : index
    %c0_5 = arith.constant 0 : index
    %2 = vector.load %arg4[%c0_3, %c0_4, %c0_5] : memref<2x32x32xf32, #tpu.memory_space<vmem>>, vector<1x32x32xf32>
    %3 = vector.shape_cast %2 : vector<1x32x32xf32> to vector<32x32xf32>
    %c1 = arith.constant 1 : index
    %c0_6 = arith.constant 0 : index
    %c0_7 = arith.constant 0 : index
    %4 = vector.load %arg4[%c1, %c0_6, %c0_7] : memref<2x32x32xf32, #tpu.memory_space<vmem>>, vector<1x32x32xf32>
    %5 = vector.shape_cast %4 : vector<1x32x32xf32> to vector<32x32xf32>
    %c0_8 = arith.constant 0 : index
    %c0_9 = arith.constant 0 : index
    %c0_10 = arith.constant 0 : index
    %6 = vector.load %arg5[%c0_8, %c0_9, %c0_10] : memref<2x32x1xf32, #tpu.memory_space<vmem>>, vector<1x32x1xf32>
    %7 = vector.shape_cast %6 : vector<1x32x1xf32> to vector<32x1xf32>
    %c1_11 = arith.constant 1 : index
    %c0_12 = arith.constant 0 : index
    %c0_13 = arith.constant 0 : index
    %8 = vector.load %arg5[%c1_11, %c0_12, %c0_13] : memref<2x32x1xf32, #tpu.memory_space<vmem>>, vector<1x32x1xf32>
    %9 = vector.shape_cast %8 : vector<1x32x1xf32> to vector<32x1xf32>
    %c0_i32 = arith.constant 0 : i32
    %c256_i32 = arith.constant 256 : i32
    %10 = arith.muli %c0_i32, %c256_i32 : i32
    %11 = tpu.assume_multiple %10, 256 : i32
    %c0_14 = arith.constant 0 : index
    %12 = arith.index_cast %11 : i32 to index
    %13 = vector.load %arg1[%c0_14, %12] : memref<5x512xf32, #tpu.memory_space<vmem>>, vector<5x256xf32>
    %cst = arith.constant dense<0.000000e+00> : vector<32x256xf32>
    %14 = tpu.matmul %0, %13, %cst {dimension_numbers = #tpu.dot_dimension_numbers<[1], [0], [0], [1], [0, 0, 1, 1], [], []>} : vector<32x5xf32>, vector<5x256xf32>, vector<32x256xf32> -> vector<32x256xf32>
    %15 = vector.broadcast %1 : vector<32x1xf32> to vector<32x256xf32>
    %16 = arith.addf %14, %15 : vector<32x256xf32>
    %17 = math.tanh %16 : vector<32x256xf32>
    %cst_15 = arith.constant dense<0.000000e+00> : vector<32x256xf32>
    %18 = tpu.matmul %3, %17, %cst_15 {dimension_numbers = #tpu.dot_dimension_numbers<[1], [0], [0], [1], [0, 0, 1, 1], [], []>} : vector<32x32xf32>, vector<32x256xf32>, vector<32x256xf32> -> vector<32x256xf32>
    %19 = vector.broadcast %7 : vector<32x1xf32> to vector<32x256xf32>
    %20 = arith.addf %18, %19 : vector<32x256xf32>
    %21 = math.tanh %20 : vector<32x256xf32>
    %cst_16 = arith.constant 5.000000e-01 : f32
    %22 = vector.broadcast %cst_16 : f32 to vector<32x256xf32>
    %23 = arith.mulf %22, %21 : vector<32x256xf32>
    %24 = arith.addf %17, %23 : vector<32x256xf32>
    %cst_17 = arith.constant dense<0.000000e+00> : vector<32x256xf32>
    %25 = tpu.matmul %5, %24, %cst_17 {dimension_numbers = #tpu.dot_dimension_numbers<[1], [0], [0], [1], [0, 0, 1, 1], [], []>} : vector<32x32xf32>, vector<32x256xf32>, vector<32x256xf32> -> vector<32x256xf32>
    %26 = vector.broadcast %9 : vector<32x1xf32> to vector<32x256xf32>
    %27 = arith.addf %25, %26 : vector<32x256xf32>
    %28 = math.tanh %27 : vector<32x256xf32>
    %cst_18 = arith.constant 5.000000e-01 : f32
    %29 = vector.broadcast %cst_18 : f32 to vector<32x256xf32>
    %30 = arith.mulf %29, %28 : vector<32x256xf32>
    %31 = arith.addf %24, %30 : vector<32x256xf32>
    %32 = tpu.transpose %31, [1, 0] : vector<32x256xf32> -> vector<256x32xf32>
    %33 = arith.index_cast %11 : i32 to index
    %c0_19 = arith.constant 0 : index
    %34 = vector.load %arg6[%33, %c0_19] : memref<512x32xf32, #tpu.memory_space<vmem>>, vector<256x32xf32>
    tpu.vector_store %arg6[%33, %c0_19], %32 {strides = array<i32>} : memref<512x32xf32, #tpu.memory_space<vmem>>, vector<256x32xf32>,
    %c1_i32 = arith.constant 1 : i32
    %c256_i32_20 = arith.constant 256 : i32
    %35 = arith.muli %c1_i32, %c256_i32_20 : i32
    %36 = tpu.assume_multiple %35, 256 : i32
    %c0_21 = arith.constant 0 : index
    %37 = arith.index_cast %36 : i32 to index
    %38 = vector.load %arg1[%c0_21, %37] : memref<5x512xf32, #tpu.memory_space<vmem>>, vector<5x256xf32>
    %cst_22 = arith.constant dense<0.000000e+00> : vector<32x256xf32>
    %39 = tpu.matmul %0, %38, %cst_22 {dimension_numbers = #tpu.dot_dimension_numbers<[1], [0], [0], [1], [0, 0, 1, 1], [], []>} : vector<32x5xf32>, vector<5x256xf32>, vector<32x256xf32> -> vector<32x256xf32>
    %40 = vector.broadcast %1 : vector<32x1xf32> to vector<32x256xf32>
    %41 = arith.addf %39, %40 : vector<32x256xf32>
    %42 = math.tanh %41 : vector<32x256xf32>
    %cst_23 = arith.constant dense<0.000000e+00> : vector<32x256xf32>
    %43 = tpu.matmul %3, %42, %cst_23 {dimension_numbers = #tpu.dot_dimension_numbers<[1], [0], [0], [1], [0, 0, 1, 1], [], []>} : vector<32x32xf32>, vector<32x256xf32>, vector<32x256xf32> -> vector<32x256xf32>
    %44 = vector.broadcast %7 : vector<32x1xf32> to vector<32x256xf32>
    %45 = arith.addf %43, %44 : vector<32x256xf32>
    %46 = math.tanh %45 : vector<32x256xf32>
    %cst_24 = arith.constant 5.000000e-01 : f32
    %47 = vector.broadcast %cst_24 : f32 to vector<32x256xf32>
    %48 = arith.mulf %47, %46 : vector<32x256xf32>
    %49 = arith.addf %42, %48 : vector<32x256xf32>
    %cst_25 = arith.constant dense<0.000000e+00> : vector<32x256xf32>
    %50 = tpu.matmul %5, %49, %cst_25 {dimension_numbers = #tpu.dot_dimension_numbers<[1], [0], [0], [1], [0, 0, 1, 1], [], []>} : vector<32x32xf32>, vector<32x256xf32>, vector<32x256xf32> -> vector<32x256xf32>
    %51 = vector.broadcast %9 : vector<32x1xf32> to vector<32x256xf32>
    %52 = arith.addf %50, %51 : vector<32x256xf32>
    %53 = math.tanh %52 : vector<32x256xf32>
    %cst_26 = arith.constant 5.000000e-01 : f32
    %54 = vector.broadcast %cst_26 : f32 to vector<32x256xf32>
    %55 = arith.mulf %54, %53 : vector<32x256xf32>
    %56 = arith.addf %49, %55 : vector<32x256xf32>
    %57 = tpu.transpose %56, [1, 0] : vector<32x256xf32> -> vector<256x32xf32>
    %58 = arith.index_cast %36 : i32 to index
    %c0_27 = arith.constant 0 : index
    %59 = vector.load %arg6[%58, %c0_27] : memref<512x32xf32, #tpu.memory_space<vmem>>, vector<256x32xf32>
    tpu.vector_store %arg6[%58, %c0_27], %57 {strides = array<i32>} : memref<512x32xf32, #tpu.memory_space<vmem>>, vector<256x32xf32>,
    %c2_i32 = arith.constant 2 : i32
    return
  }
  func.func @transform_0(%arg0: i32) -> (i32, i32) {
    %c0_i32 = arith.constant 0 : i32
    %c0_i32_0 = arith.constant 0 : i32
    return %c0_i32, %arg0 : i32, i32
  }
  func.func @transform_1(%arg0: i32) -> (i32, i32) {
    %c0_i32 = arith.constant 0 : i32
    %c0_i32_0 = arith.constant 0 : i32
    %c0_i32_1 = arith.constant 0 : i32
    return %c0_i32, %c0_i32_0 : i32, i32
  }
  func.func @transform_2(%arg0: i32) -> (i32, i32) {
    %c0_i32 = arith.constant 0 : i32
    %c0_i32_0 = arith.constant 0 : i32
    %c0_i32_1 = arith.constant 0 : i32
    return %c0_i32, %c0_i32_0 : i32, i32
  }
  func.func @transform_3(%arg0: i32) -> (i32, i32, i32) {
    %c0_i32 = arith.constant 0 : i32
    %c0_i32_0 = arith.constant 0 : i32
    %c0_i32_1 = arith.constant 0 : i32
    %c0_i32_2 = arith.constant 0 : i32
    return %c0_i32, %c0_i32_0, %c0_i32_1 : i32, i32, i32
  }
  func.func @transform_4(%arg0: i32) -> (i32, i32, i32) {
    %c0_i32 = arith.constant 0 : i32
    %c0_i32_0 = arith.constant 0 : i32
    %c0_i32_1 = arith.constant 0 : i32
    %c0_i32_2 = arith.constant 0 : i32
    return %c0_i32, %c0_i32_0, %c0_i32_1 : i32, i32, i32
  }
  func.func @transform_5(%arg0: i32) -> (i32, i32) {
    %c0_i32 = arith.constant 0 : i32
    %c0_i32_0 = arith.constant 0 : i32
    return %arg0, %c0_i32 : i32, i32
  }
}

</mosaic_0001>

<bundles_post_ra>
// kernel: resnn_forward.1
= control target key start
LH: loop header
LB: loop body
LE: loop exit
PB: predicated region body
PF: predicated region fallthrough
CT: control target
= control target key end

     0   :  { %10 = vsyncpa [#allocation3], 0  ;;  %s1409_s18 = smov 0   ;;  %s1926_s0 = inlined_call_operand.vmem [shape: f32[5,2048], index: 0, kind: input, shape index: {}]   ;;  %s1927_s1 = inlined_call_operand.vmem [shape: f32[32,5], index: 1, kind: input, shape index: {}]   ;;  %s1928_s2 = inlined_call_operand.vmem [shape: f32[32,1], index: 2, kind: input, shape index: {}]   ;;  %s1929_s3 = inlined_call_operand.hbm [shape: f32[2,32,32], index: 3, kind: input, shape index: {}]   ;;  %s1930_s4 = inlined_call_operand.vmem [shape: f32[2,32,1], index: 4, kind: input, shape index: {}]   ;;  %s1931_s5 = inlined_call_operand.vmem [shape: f32[2048,32], index: 5, kind: output, shape index: {}]  }
   0x1 LB: > { %s174_s21 = sshll.u32 %s1929_s3, 4  ;;  %s1418_s22 = sadd.s32 4294967295, %s1373_s18   ;;  %s1373_s18 = sphi %s1409_s18, %s16_s18   ;;  %s175_s21 = int_to_ptr.hbm [resolvable:$true] %s174_s21 }
   0x2   : > { %p1110_p0 = scmp.ge.s32.totalorder %s1373_s18, 1  ;;  %p157_p1 = scmp.lt.s32.totalorder %s1373_s18, 5 }
   0x3   : > { %p1219_p2 = scmp.eq.s32.totalorder %s1418_s22, 0  ;;  %s1375_s23 = smov [#allocation2]  }
   0x4   : > { %p158_p3 = pnand %p1110_p0, %p157_p1  ;;  %s176_s24 = sshll.u32 %s1375_s23, 4  ;;  %s177_s24 = int_to_ptr.vmem [resolvable:$true] %s176_s24 }
   0x5   : > { %s1376_s25 = smov 128   ;;  %s1377_s26 = smov 8  }
   0x6   : > { %p1215_p4 = pneg %p158_p3  ;;  %204 = sbr.rel (%p158_p3) target bundleno = 996 (0x3e4), region = 40 }
   0x8   : > { %p1216_p5 = pnand %p1219_p2, %p1215_p4 }
   0xa   : > { %1218 = dma.hbm_to_vmem [thread:$0]  (!%p1216_p5), %s175_s21, 1024, %s177_s24, [#allocation3], %s1376_s25, %s1376_s25, %s1377_s26  }
   0xb   : > { %1368 = dma.done.wait (%p1219_p2), [#allocation3], 1024  }
   0xc   : > { %1370 = vsyncadd (%p1219_p2), [#allocation3], 4294966272  ;;  %s1115_s27 = sshll.u32 %s1418_s22, 2  ;;  %v1378_v0 = vmov 0   ;;  %vm306_vm0 = vcmask 1044480   ;;  %vm293_vm1 = vcmask 39936  }
   0xd   : > { %p234_p6 = scmp.lt.s32.totalorder %s1115_s27, 15  ;;  %1235 = vset.pattern.permute.xlu1 %v1378_v0  ;;  %1234 = vset.pattern.permute.xlu0 %v1378_v0  ;;  %v1434_v3 = vld [vmem:[%s1927_s1] sm:$0xff]  ;;  %v250_v4 = vld [vmem:[%s1928_s2 + $0x8] sm:$0xff]  ;;  %v252_v5 = vld [vmem:[%s1928_s2 + $0x18] sm:$0xff]  ;;  %vm399_vm2 = vcmask 261120   ;;  %s1117_s16 = sshll.u32 %s1418_s22, 6 }
   0xe   : > { %1236 = vset.pattern.permute.xlu2 %v1378_v0  ;;  %280 = vperm.xlu1 %1235, %v250_v4   ;;  %v1451_v6 = vld [vmem:[%s1927_s1 + $0x8] sm:$0xff]  ;;  %v249_v7 = vld [vmem:[%s1928_s2] sm:$0xff]  ;;  %v251_v8 = vld [vmem:[%s1928_s2 + $0x10] sm:$0xff]  ;;  %p240_p7 = scmp.lt.s32.totalorder %s1117_s16, 255 }
   0xf   : > { %s1933_s27 = smov (!%p234_p6, %s1115_s27), 15  ;;  %290 = vperm.xlu0 %1234, %v252_v5   ;;  %v1466_v9 = vld [vmem:[%s1927_s1 + $0x10] sm:$0xff]  ;;  %v263_v10 = vld [vmem:[%s1930_s4 + $0x8] sm:$0xff]  ;;  %v262_v11 = vld [vmem:[%s1930_s4] sm:$0xff] }
  0x10   : > { %s1116_s28 = sshll.u32 %s1933_s27, 3  ;;  %v1481_v12 = vld [vmem:[%s1927_s1 + $0x18] sm:$0xff]  ;;  %v1120_v13 = vld [vmem:[%s1930_s4 + $0x28] sm:$0xff]  ;;  %v1121_v14 = vld [vmem:[%s1930_s4 + $0x30] sm:$0xff]  ;;  %s1935_s16 = smov (!%p240_p7, %s1117_s16), 255 }
  0x11   : > { %s1427_s6 = scalar_lea.vmem %s1926_s0, %s1116_s28  ;;  %v1526_v41 = vld [vmem:[#allocation2] sm:$0xff]  ;;  %v265_v46 = vld [vmem:[%s1930_s4 + $0x18] sm:$0xff]  ;;  %v1546_v47 = vld [vmem:[#allocation2 + $0x8] sm:$0xff]  ;;  %s1118_s17 = sshll.u32 %s1935_s16, 3 }
  0x12   : > { %v271_v1 = vld [vmem:[%s1427_s6] sm:$0x1f]  ;;  %v272_v2 = vld [vmem:[%s1427_s6 + $0x8] sm:$0x1f]  ;;  %v1149_v43 = vld [vmem:[%s1427_s6 + $0x10] sm:$0x1f]  ;;  %396 = vperm.xlu2 %1236, %v265_v46   ;;  %s1783_s21 = scalar_lea.vmem %s1931_s5, %s1118_s17 }
  0x13   : > { %1123 = vmatpush.msk.msra.mxu0 %vm306_vm0, %v271_v1  ;;  %1128 = vmatpush.msk.msra.mxu1 %vm306_vm0, %v272_v2  ;;  %v1150_v45 = vld [vmem:[%s1427_s6 + $0x18] sm:$0x1f]  ;;  %v264_v48 = vld [vmem:[%s1930_s4 + $0x10] sm:$0xff]  ;;  %v1119_v50 = vld [vmem:[%s1930_s4 + $0x20] sm:$0xff] }
  0x14   : > { %1124 = vmatmul.msk.f32.vlgmr.msra.gmra.mxu0 %vm293_vm1, %v1434_v3  ;;  %1129 = vmatmul.msk.f32.vlgmr.msra.gmra.mxu1 %vm293_vm1, %v1434_v3  ;;  %v1555_v49 = vld [vmem:[#allocation2 + $0x10] sm:$0xff]  ;;  %v1564_v51 = vld [vmem:[#allocation2 + $0x18] sm:$0xff]  ;;  %v1631_v46 = vld [vmem:[#allocation2 + $0x20] sm:$0xff] }
  0x15   : > { %v1122_v52 = vld [vmem:[%s1930_s4 + $0x38] sm:$0xff] }
  0x16   : > { %275 = vperm.xlu1 %1235, %v249_v7  }
  0x17   : > { %285 = vperm.xlu0 %1234, %v251_v8  }
  0x1a   : > { %391 = vperm.xlu2 %1236, %v264_v48  }
  0x1c   : > { %1125 = vmatmul.msk.f32.gmra.mxu0 %vm293_vm1, %v1451_v6  ;;  %1130 = vmatmul.msk.f32.gmra.mxu1 %vm293_vm1, %v1451_v6 }
  0x1e   : > { %381 = vperm.xlu1 %1235, %v262_v11  }
  0x1f   : > { %386 = vperm.xlu0 %1234, %v263_v10  }
  0x22   : > { %496 = vperm.xlu2 %1236, %v1119_v50  }
  0x24   : > { %1126 = vmatmul.msk.f32.gmra.mxu0 %vm293_vm1, %v1466_v9  ;;  %1131 = vmatmul.msk.f32.gmra.mxu1 %vm293_vm1, %v1466_v9 }
  0x26   : > { %506 = vperm.xlu1 %1235, %v1121_v14  }
  0x27   : > { %501 = vperm.xlu0 %1234, %v1120_v13  }
  0x2a   : > { %511 = vperm.xlu2 %1236, %v1122_v52  }
  0x2c   : > { %1127 = vmatmul.msk.f32.gmra.mxu0 %vm293_vm1, %v1481_v12  ;;  %1132 = vmatmul.msk.f32.gmra.mxu1 %vm293_vm1, %v1481_v12 }
  0x6c   : > { %v1589_v57 = vpop.permute.xlu2 %396 }
  0x74   : > { %v1594_v62 = vpop.permute.xlu2 %391 }
  0x80   : > { %v1495_v22 = vpop.permute.xlu1 %280 }
  0x81   : > { %v1493_v19 = vpop.permute.xlu0 %290 }
  0x88   : > { %v1503_v30 = vpop.permute.xlu1 %275 }
  0x89   : > { %v1497_v23 = vpop.permute.xlu0 %285 }
  0x90   : > { %v1599_v2 = vpop.permute.xlu1 %381 }
  0x91   : > { %v330_v15 = vpop.f32.mrf.mxu0  ;;  %v359_v16 = vpop.f32.mrf.mxu1 }
  0x92   : > { %v331_v33 = vadd.f32 %v330_v15, %v1503_v30  ;;  %v360_v34 = vadd.f32 %v359_v16, %v1503_v30  ;;  %v1591_v60 = vpop.permute.xlu0 %386 }
  0x99   : > { %v333_v17 = vpop.f32.mrf.mxu0  ;;  %v362_v18 = vpop.f32.mrf.mxu1 }
  0x9a   : > { %v334_v31 = vadd.f32 %v333_v17, %v1495_v22  ;;  %v363_v32 = vadd.f32 %v362_v18, %v1495_v22 }
  0xa1   : > { %v336_v20 = vpop.f32.mrf.mxu0  ;;  %v365_v21 = vpop.f32.mrf.mxu1 }
  0xa2   : > { %v337_v26 = vadd.f32 %v336_v20, %v1497_v23  ;;  %v366_v29 = vadd.f32 %v365_v21, %v1497_v23 }
  0xa9   : > { %v339_v24 = vpop.f32.mrf.mxu0  ;;  %v368_v25 = vpop.f32.mrf.mxu1 }
  0xaa   : > { %v340_v27 = vadd.f32 %v339_v24, %v1493_v19  ;;  %v369_v28 = vadd.f32 %v368_v25, %v1493_v19 }
  0xac   : > { %1237 = vtanh.f32 %v340_v27 }
  0xad   : > { %1239 = vtanh.f32 %v369_v28 }
  0xae   : > { %1241 = vtanh.f32 %v337_v26 }
  0xaf   : > { %1243 = vtanh.f32 %v366_v29 }
  0xb0   : > { %1245 = vtanh.f32 %v334_v31 }
  0xb1   : > { %1247 = vtanh.f32 %v363_v32 }
  0xb2   : > { %v1509_v35 = vpop.eup %1237  ;;  %1249 = vtanh.f32 %v331_v33 }
  0xb3   : > { %v1511_v36 = vpop.eup %1239  ;;  %1251 = vtanh.f32 %v360_v34  ;;  %424 = vmatpush.msra.mxu2 %v1509_v35 }
  0xb4   : > { %v1514_v37 = vpop.eup %1241  ;;  %453 = vmatpush.msra.mxu3 %v1511_v36 }
  0xb5   : > { %v1517_v38 = vpop.eup %1243  ;;  %425 = vmatpush.msra.mxu2 %v1514_v37 }
  0xb6   : > { %v1520_v39 = vpop.eup %1245  ;;  %454 = vmatpush.msra.mxu3 %v1517_v38 }
  0xb7   : > { %v1523_v40 = vpop.eup %1247  ;;  %426 = vmatpush.msra.mxu2 %v1520_v39 }
  0xb8   : > { %v1528_v42 = vpop.eup %1249  ;;  %455 = vmatpush.msra.mxu3 %v1523_v40 }
  0xb9   : > { %v1532_v44 = vpop.eup %1251  ;;  %427 = vmatpush.msra.mxu2 %v1528_v42 }
  0xba   : > { %456 = vmatpush.msra.mxu3 %v1532_v44  ;;  %1133 = vmatmul.msk.f32.vlgmr.msra.gmra.mxu2 %vm399_vm2, %v1526_v41 }
  0xbb   : > { %1137 = vmatmul.msk.f32.vlgmr.msra.gmra.mxu3 %vm399_vm2, %v1526_v41  ;;  %1151 = vmatpush.msk.msrb.mxu2 %vm306_vm0, %v1149_v43 }
  0xbc   : > { %1156 = vmatpush.msk.msrb.mxu3 %vm306_vm0, %v1150_v45 }
  0xc2   : > { %1134 = vmatmul.msk.f32.gmra.mxu2 %vm399_vm2, %v1546_v47 }
  0xc3   : > { %1138 = vmatmul.msk.f32.gmra.mxu3 %vm399_vm2, %v1546_v47 }
  0xca   : > { %1135 = vmatmul.msk.f32.gmra.mxu2 %vm399_vm2, %v1555_v49 }
  0xcb   : > { %1139 = vmatmul.msk.f32.gmra.mxu3 %vm399_vm2, %v1555_v49 }
  0xd2   : > { %1136 = vmatmul.msk.f32.gmra.mxu2 %vm399_vm2, %v1564_v51 }
  0xd3   : > { %1140 = vmatmul.msk.f32.gmra.mxu3 %vm399_vm2, %v1564_v51 }
  0xda   : > { %1152 = vmatmul.msk.f32.vlgmr.msrb.gmra.mxu2 %vm293_vm1, %v1434_v3 }
  0xdb   : > { %1157 = vmatmul.msk.f32.vlgmr.msrb.gmra.mxu3 %vm293_vm1, %v1434_v3 }
  0xe2   : > { %1153 = vmatmul.msk.f32.gmra.mxu2 %vm293_vm1, %v1451_v6 }
  0xe3   : > { %1158 = vmatmul.msk.f32.gmra.mxu3 %vm293_vm1, %v1451_v6 }
  0xea   : > { %1154 = vmatmul.msk.f32.gmra.mxu2 %vm293_vm1, %v1466_v9 }
  0xeb   : > { %1159 = vmatmul.msk.f32.gmra.mxu3 %vm293_vm1, %v1466_v9 }
  0xf2   : > { %1155 = vmatmul.msk.f32.gmra.mxu2 %vm293_vm1, %v1481_v12 }
  0xf3   : > { %1160 = vmatmul.msk.f32.gmra.mxu3 %vm293_vm1, %v1481_v12 }
 0x13d   : > { %v429_v53 = vpop.f32.mrf.mxu2 }
 0x13e   : > { %v458_v54 = vpop.f32.mrf.mxu3  ;;  %v430_v4 = vadd.f32 %v429_v53, %v1599_v2 }
 0x13f   : > { %v459_v7 = vadd.f32 %v458_v54, %v1599_v2 }
 0x145   : > { %v432_v55 = vpop.f32.mrf.mxu2 }
 0x146   : > { %v461_v56 = vpop.f32.mrf.mxu3  ;;  %v433_v61 = vadd.f32 %v432_v55, %v1591_v60  ;;  %v1653_v55 = vld [vmem:[#allocation2 + $0x30] sm:$0xff] }
 0x147   : > { %v462_v63 = vadd.f32 %v461_v56, %v1591_v60 }
 0x148   : > { %1253 = vtanh.f32 %v433_v61 }
 0x149   : > { %1255 = vtanh.f32 %v462_v63 }
 0x14d   : > { %v435_v58 = vpop.f32.mrf.mxu2 }
 0x14e   : > { %v464_v59 = vpop.f32.mrf.mxu3  ;;  %v436_v0 = vadd.f32 %v435_v58, %v1594_v62  ;;  %v1254_v9 = vpop.eup %1253 }
 0x14f   : > { %v465_v1 = vadd.f32 %v464_v59, %v1594_v62  ;;  %v1256_v10 = vpop.eup %1255  ;;  %v480_v26 = vmul.f32 0.5, %v1254_v9 }
 0x150   : > { %1257 = vtanh.f32 %v436_v0  ;;  %v481_v28 = vmul.f32 0.5, %v1256_v10 }
 0x151   : > { %1259 = vtanh.f32 %v465_v1  ;;  %v1621_v43 = vadd.f32 %v1520_v39, %v480_v26 }
 0x152   : > { %v1625_v45 = vadd.f32 %v1523_v40, %v481_v28 }
 0x155   : > { %v438_v3 = vpop.f32.mrf.mxu2 }
 0x156   : > { %v439_v5 = vadd.f32 %v438_v3, %v1589_v57  ;;  %v467_v6 = vpop.f32.mrf.mxu3  ;;  %v1258_v11 = vpop.eup %1257 }
 0x157   : > { %v468_v8 = vadd.f32 %v467_v6, %v1589_v57  ;;  %v1260_v12 = vpop.eup %1259  ;;  %v482_v17 = vmul.f32 0.5, %v1258_v11 }
 0x158   : > { %1261 = vtanh.f32 %v439_v5  ;;  %v483_v21 = vmul.f32 0.5, %v1260_v12  ;;  %v1709_v5 = vpop.permute.xlu2 %496 }
 0x159   : > { %1263 = vtanh.f32 %v468_v8  ;;  %v1613_v32 = vadd.f32 %v1514_v37, %v482_v17  ;;  %v1713_v8 = vpop.permute.xlu0 %501  ;;  %v1719_v17 = vpop.permute.xlu1 %506 }
 0x15a   : > { %1265 = vtanh.f32 %v430_v4  ;;  %v1617_v34 = vadd.f32 %v1517_v38, %v483_v21 }
 0x15b   : > { %1267 = vtanh.f32 %v459_v7 }
 0x15d   : > { %v730_v13 = vpop.f32.mrf.mxu2 }
 0x15e   : > { %v1262_v14 = vpop.eup %1261  ;;  %v759_v15 = vpop.f32.mrf.mxu3  ;;  %v731_v59 = vadd.f32 %v730_v13, %v1503_v30 }
 0x15f   : > { %v1264_v16 = vpop.eup %1263  ;;  %v484_v18 = vmul.f32 0.5, %v1262_v14  ;;  %v760_v61 = vadd.f32 %v759_v15, %v1503_v30 }
 0x160   : > { %v1266_v20 = vpop.eup %1265  ;;  %v485_v24 = vmul.f32 0.5, %v1264_v16 }
 0x161   : > { %v1268_v25 = vpop.eup %1267  ;;  %v1606_v27 = vadd.f32 %v1509_v35, %v484_v18  ;;  %v478_v31 = vmul.f32 0.5, %v1266_v20 }
 0x162   : > { %v1609_v29 = vadd.f32 %v1511_v36, %v485_v24  ;;  %v479_v33 = vmul.f32 0.5, %v1268_v25 }
 0x163   : > { %538 = vmatpush.msrb.mxu0 %v1606_v27  ;;  %v1629_v37 = vadd.f32 %v1528_v42, %v478_v31  ;;  %v1643_v42 = vld [vmem:[#allocation2 + $0x28] sm:$0xff] }
 0x164   : > { %567 = vmatpush.msrb.mxu1 %v1609_v29  ;;  %v1635_v38 = vadd.f32 %v1532_v44, %v479_v33 }
 0x165   : > { %539 = vmatpush.msrb.mxu0 %v1613_v32  ;;  %v733_v35 = vpop.f32.mrf.mxu2 }
 0x166   : > { %568 = vmatpush.msrb.mxu1 %v1617_v34  ;;  %v762_v36 = vpop.f32.mrf.mxu3  ;;  %v734_v56 = vadd.f32 %v733_v35, %v1495_v22 }
 0x167   : > { %540 = vmatpush.msrb.mxu0 %v1621_v43  ;;  %v763_v58 = vadd.f32 %v762_v36, %v1495_v22  ;;  %v1668_v22 = vld [vmem:[#allocation2 + $0x38] sm:$0xff]  ;;  %v1725_v36 = vpop.permute.xlu2 %511 }
 0x168   : > { %569 = vmatpush.msrb.mxu1 %v1625_v45 }
 0x169   : > { %541 = vmatpush.msrb.mxu0 %v1629_v37 }
 0x16a   : > { %570 = vmatpush.msrb.mxu1 %v1635_v38  ;;  %1141 = vmatmul.msk.f32.vlgmr.msrb.gmra.mxu0 %vm399_vm2, %v1631_v46 }
 0x16b   : > { %1145 = vmatmul.msk.f32.vlgmr.msrb.gmra.mxu1 %vm399_vm2, %v1631_v46 }
 0x16d   : > { %v736_v39 = vpop.f32.mrf.mxu2 }
 0x16e   : > { %v765_v40 = vpop.f32.mrf.mxu3  ;;  %v737_v48 = vadd.f32 %v736_v39, %v1497_v23 }
 0x16f   : > { %v766_v53 = vadd.f32 %v765_v40, %v1497_v23 }
 0x172   : > { %1142 = vmatmul.msk.f32.gmra.mxu0 %vm399_vm2, %v1643_v42 }
 0x173   : > { %1146 = vmatmul.msk.f32.gmra.mxu1 %vm399_vm2, %v1643_v42 }
 0x175   : > { %v739_v44 = vpop.f32.mrf.mxu2 }
 0x176   : > { %v740_v50 = vadd.f32 %v739_v44, %v1493_v19  ;;  %v768_v52 = vpop.f32.mrf.mxu3 }
 0x177   : > { %v769_v54 = vadd.f32 %v768_v52, %v1493_v19 }
 0x178   : > { %1269 = vtanh.f32 %v740_v50 }
 0x179   : > { %1271 = vtanh.f32 %v769_v54 }
 0x17a   : > { %1273 = vtanh.f32 %v737_v48  ;;  %1143 = vmatmul.msk.f32.gmra.mxu0 %vm399_vm2, %v1653_v55 }
 0x17b   : > { %1275 = vtanh.f32 %v766_v53  ;;  %1147 = vmatmul.msk.f32.gmra.mxu1 %vm399_vm2, %v1653_v55 }
 0x17c   : > { %1277 = vtanh.f32 %v734_v56 }
 0x17d   : > { %1279 = vtanh.f32 %v763_v58 }
 0x17e   : > { %v1663_v19 = vpop.eup %1269  ;;  %1281 = vtanh.f32 %v731_v59 }
 0x17f   : > { %v1665_v23 = vpop.eup %1271  ;;  %1283 = vtanh.f32 %v760_v61  ;;  %791 = vmatpush.msra.mxu0 %v1663_v19 }
 0x180   : > { %v1670_v63 = vpop.eup %1273  ;;  %820 = vmatpush.msra.mxu1 %v1665_v23 }
 0x181   : > { %v1673_v30 = vpop.eup %1275  ;;  %792 = vmatpush.msra.mxu0 %v1670_v63 }
 0x182   : > { %v1676_v0 = vpop.eup %1277  ;;  %821 = vmatpush.msra.mxu1 %v1673_v30  ;;  %1144 = vmatmul.msk.f32.gmra.mxu0 %vm399_vm2, %v1668_v22 }
 0x183   : > { %v1681_v1 = vpop.eup %1279  ;;  %1148 = vmatmul.msk.f32.gmra.mxu1 %vm399_vm2, %v1668_v22  ;;  %793 = vmatpush.msra.mxu0 %v1676_v0 }
 0x184   : > { %v1686_v3 = vpop.eup %1281  ;;  %822 = vmatpush.msra.mxu1 %v1681_v1 }
 0x185   : > { %v1689_v4 = vpop.eup %1283  ;;  %794 = vmatpush.msra.mxu0 %v1686_v3 }
 0x186   : > { %823 = vmatpush.msra.mxu1 %v1689_v4 }
 0x18a   : > { %1161 = vmatmul.msk.f32.vlgmr.msra.gmra.mxu0 %vm399_vm2, %v1526_v41 }
 0x18b   : > { %1165 = vmatmul.msk.f32.vlgmr.msra.gmra.mxu1 %vm399_vm2, %v1526_v41 }
 0x192   : > { %1162 = vmatmul.msk.f32.gmra.mxu0 %vm399_vm2, %v1546_v47 }
 0x193   : > { %1166 = vmatmul.msk.f32.gmra.mxu1 %vm399_vm2, %v1546_v47 }
 0x19a   : > { %1163 = vmatmul.msk.f32.gmra.mxu0 %vm399_vm2, %v1555_v49 }
 0x19b   : > { %1167 = vmatmul.msk.f32.gmra.mxu1 %vm399_vm2, %v1555_v49 }
 0x1a2   : > { %1164 = vmatmul.msk.f32.gmra.mxu0 %vm399_vm2, %v1564_v51 }
 0x1a3   : > { %1168 = vmatmul.msk.f32.gmra.mxu1 %vm399_vm2, %v1564_v51 }
 0x1e7   : > { %v543_v41 = vpop.f32.mrf.mxu0 }
 0x1e8   : > { %v544_v6 = vadd.f32 %v543_v41, %v1709_v5  ;;  %v572_v7 = vpop.f32.mrf.mxu1 }
 0x1e9   : > { %v573_v47 = vadd.f32 %v572_v7, %v1709_v5 }
 0x1ea   : > { %1285 = vtanh.f32 %v544_v6 }
 0x1eb   : > { %1287 = vtanh.f32 %v573_v47 }
 0x1ef   : > { %v546_v9 = vpop.f32.mrf.mxu0 }
 0x1f0   : > { %v1286_v49 = vpop.eup %1285  ;;  %v547_v10 = vadd.f32 %v546_v9, %v1713_v8  ;;  %v575_v11 = vpop.f32.mrf.mxu1 }
 0x1f1   : > { %v1288_v12 = vpop.eup %1287  ;;  %v592_v13 = vmul.f32 0.5, %v1286_v49  ;;  %v576_v51 = vadd.f32 %v575_v11, %v1713_v8 }
 0x1f2   : > { %v593_v14 = vmul.f32 0.5, %v1288_v12  ;;  %1289 = vtanh.f32 %v547_v10 }
 0x1f3   : > { %1291 = vtanh.f32 %v576_v51  ;;  %v600_v15 = vadd.f32 %v592_v13, %v1629_v37 }
 0x1f4   : > { %v601_v16 = vadd.f32 %v593_v14, %v1635_v38 }
 0x1f5   : > { %608 = vxpose.xlu0.b32.start [1/4] (short) %v600_v15, 128 }
 0x1f6   : > { %640 = vxpose.xlu1.b32.start [1/4] (short) %v601_v16, 128 }
 0x1f7   : > { %v549_v18 = vpop.f32.mrf.mxu0 }
 0x1f8   : > { %v1290_v20 = vpop.eup %1289  ;;  %v550_v21 = vadd.f32 %v549_v18, %v1719_v17  ;;  %v578_v24 = vpop.f32.mrf.mxu1 }
 0x1f9   : > { %v1292_v25 = vpop.eup %1291  ;;  %v594_v26 = vmul.f32 0.5, %v1290_v20  ;;  %v579_v28 = vadd.f32 %v578_v24, %v1719_v17 }
 0x1fa   : > { %v595_v31 = vmul.f32 0.5, %v1292_v25  ;;  %1293 = vtanh.f32 %v550_v21 }
 0x1fb   : > { %v602_v33 = vadd.f32 %v594_v26, %v1621_v43  ;;  %1295 = vtanh.f32 %v579_v28 }
 0x1fc   : > { %v603_v35 = vadd.f32 %v595_v31, %v1625_v45 }
 0x1fd   : > { %609 = vxpose.xlu0.b32.cont [2/4] (short) %v602_v33, 128 }
 0x1fe   : > { %641 = vxpose.xlu1.b32.cont [2/4] (short) %v603_v35, 128 }
 0x1ff   : > { %v552_v37 = vpop.f32.mrf.mxu0 }
 0x200   : > { %v1294_v38 = vpop.eup %1293  ;;  %v553_v39 = vadd.f32 %v552_v37, %v1725_v36  ;;  %v581_v40 = vpop.f32.mrf.mxu1 }
 0x201   : > { %v1296_v44 = vpop.eup %1295  ;;  %v596_v48 = vmul.f32 0.5, %v1294_v38  ;;  %v582_v50 = vadd.f32 %v581_v40, %v1725_v36 }
 0x202   : > { %v597_v52 = vmul.f32 0.5, %v1296_v44  ;;  %1297 = vtanh.f32 %v553_v39 }
 0x203   : > { %v604_v43 = vadd.f32 %v596_v48, %v1613_v32  ;;  %1299 = vtanh.f32 %v582_v50 }
 0x204   : > { %v605_v45 = vadd.f32 %v597_v52, %v1617_v34 }
 0x205   : > { %610 = vxpose.xlu0.b32.cont [3/4] (short) %v604_v43, 128 }
 0x206   : > { %642 = vxpose.xlu1.b32.cont [3/4] (short) %v605_v45, 128 }
 0x207   : > { %v796_v53 = vpop.f32.mrf.mxu0 }
 0x208   : > { %v1298_v54 = vpop.eup %1297  ;;  %v825_v56 = vpop.f32.mrf.mxu1 }
 0x209   : > { %v1300_v58 = vpop.eup %1299  ;;  %v598_v59 = vmul.f32 0.5, %v1298_v54  ;;  %v826_v51 = vadd.f32 %v825_v56, %v1599_v2 }
 0x20a   : > { %v599_v61 = vmul.f32 0.5, %v1300_v58 }
 0x20b   : > { %v606_v41 = vadd.f32 %v598_v59, %v1606_v27  ;;  %v797_v27 = vadd.f32 %v796_v53, %v1599_v2 }
 0x20c   : > { %v607_v6 = vadd.f32 %v599_v61, %v1609_v29 }
 0x20d   : > { %611 = vxpose.xlu0.b32.end [4/4] (short) %v606_v41, 128 }
 0x20e   : > { %643 = vxpose.xlu1.b32.end [4/4] (short) %v607_v6, 128 }
 0x20f   : > { %v799_v7 = vpop.f32.mrf.mxu0 }
 0x210   : > { %v828_v47 = vpop.f32.mrf.mxu1  ;;  %v800_v34 = vadd.f32 %v799_v7, %v1591_v60 }
 0x211   : > { %v829_v49 = vadd.f32 %v828_v47, %v1591_v60 }
 0x212   : > { %1301 = vtanh.f32 %v800_v34 }
 0x213   : > { %1303 = vtanh.f32 %v829_v49 }
 0x217   : > { %v802_v32 = vpop.f32.mrf.mxu0 }
 0x218   : > { %v831_v9 = vpop.f32.mrf.mxu1  ;;  %v803_v10 = vadd.f32 %v802_v32, %v1594_v62  ;;  %v1302_v60 = vpop.eup %1301 }
 0x219   : > { %v832_v11 = vadd.f32 %v831_v9, %v1594_v62  ;;  %v1304_v15 = vpop.eup %1303  ;;  %v847_v2 = vmul.f32 0.5, %v1302_v60 }
 0x21a   : > { %1305 = vtanh.f32 %v803_v10 }
 0x21b   : > { %1307 = vtanh.f32 %v832_v11 }
 0x21f   : > { %v805_v12 = vpop.f32.mrf.mxu0 }
 0x220   : > { %v806_v29 = vadd.f32 %v805_v12, %v1589_v57  ;;  %v834_v13 = vpop.f32.mrf.mxu1  ;;  %v1306_v62 = vpop.eup %1305 }
 0x221   : > { %v835_v14 = vadd.f32 %v834_v13, %v1589_v57  ;;  %v1308_v16 = vpop.eup %1307  ;;  %v849_v21 = vmul.f32 0.5, %v1306_v62  ;;  %v848_v57 = vmul.f32 0.5, %v1304_v15 }
 0x222   : > { %1309 = vtanh.f32 %v806_v29  ;;  %v850_v26 = vmul.f32 0.5, %v1308_v16 }
 0x223   : > { %1311 = vtanh.f32 %v835_v14  ;;  %v1749_v38 = vadd.f32 %v1670_v63, %v849_v21 }
 0x224   : > { %1313 = vtanh.f32 %v797_v27  ;;  %v1753_v40 = vadd.f32 %v1673_v30, %v850_v26 }
 0x225   : > { %1315 = vtanh.f32 %v826_v51 }
 0x228   : > { %v1310_v18 = vpop.eup %1309 }
 0x229   : > { %v1312_v20 = vpop.eup %1311  ;;  %v851_v24 = vmul.f32 0.5, %v1310_v18 }
 0x22a   : > { %v1314_v25 = vpop.eup %1313  ;;  %v852_v28 = vmul.f32 0.5, %v1312_v20 }
 0x22b   : > { %v1316_v31 = vpop.eup %1315  ;;  %v1742_v33 = vadd.f32 %v1663_v19, %v851_v24  ;;  %v845_v37 = vmul.f32 0.5, %v1314_v25  ;;  %v855_v19 = vadd.f32 %v1676_v0, %v847_v2 }
 0x22c   : > { %v1745_v35 = vadd.f32 %v1665_v23, %v852_v28  ;;  %v846_v39 = vmul.f32 0.5, %v1316_v31  ;;  %v856_v23 = vadd.f32 %v1681_v1, %v848_v57 }
 0x22d   : > { %873 = vmatpush.msra.mxu2 %v1742_v33  ;;  %v853_v44 = vadd.f32 %v1686_v3, %v845_v37 }
 0x22e   : > { %902 = vmatpush.msra.mxu3 %v1745_v35  ;;  %v854_v63 = vadd.f32 %v1689_v4, %v846_v39 }
 0x22f   : > { %874 = vmatpush.msra.mxu2 %v1749_v38 }
 0x230   : > { %903 = vmatpush.msra.mxu3 %v1753_v40 }
 0x231   : > { %875 = vmatpush.msra.mxu2 %v855_v19 }
 0x232   : > { %904 = vmatpush.msra.mxu3 %v856_v23 }
 0x233   : > { %876 = vmatpush.msra.mxu2 %v853_v44 }
 0x234   : > { %905 = vmatpush.msra.mxu3 %v854_v63  ;;  %1169 = vmatmul.msk.f32.vlgmr.msra.gmra.mxu2 %vm399_vm2, %v1631_v46 }
 0x235   : > { %1173 = vmatmul.msk.f32.vlgmr.msra.gmra.mxu3 %vm399_vm2, %v1631_v46 }
 0x23c   : > { %1170 = vmatmul.msk.f32.gmra.mxu2 %vm399_vm2, %v1643_v42 }
 0x23d   : > { %1174 = vmatmul.msk.f32.gmra.mxu3 %vm399_vm2, %v1643_v42 }
 0x244   : > { %1171 = vmatmul.msk.f32.gmra.mxu2 %vm399_vm2, %v1653_v55 }
 0x245   : > { %1175 = vmatmul.msk.f32.gmra.mxu3 %vm399_vm2, %v1653_v55 }
 0x24c   : > { %1172 = vmatmul.msk.f32.gmra.mxu2 %vm399_vm2, %v1668_v22 }
 0x24d   : > { %1176 = vmatmul.msk.f32.gmra.mxu3 %vm399_vm2, %v1668_v22 }
 0x299   : > { %v624_v55 = vpop.trf.xlu0 }
 0x29a   : > { %672 = vst.msk [vmem:[%s1783_s21] sm:$0xff] %vm399_vm2, %v624_v55  ;;  %v656_v2 = vpop.trf.xlu1 }
 0x29b   : > { %688 = vst.msk [vmem:[%s1783_s21 + $0x80] sm:$0xff] %vm399_vm2, %v656_v2 }
 0x2a1   : > { %v625_v53 = vpop.trf.xlu0 }
 0x2a2   : > { %673 = vst.msk [vmem:[%s1783_s21 + $0x8] sm:$0xff] %vm399_vm2, %v625_v53 }
 0x2a9   : > { %v626_v32 = vpop.trf.xlu0 }
 0x2aa   : > { %674 = vst.msk [vmem:[%s1783_s21 + $0x10] sm:$0xff] %vm399_vm2, %v626_v32 }
 0x2b1   : > { %v627_v51 = vpop.trf.xlu0 }
 0x2b2   : > { %675 = vst.msk [vmem:[%s1783_s21 + $0x18] sm:$0xff] %vm399_vm2, %v627_v51 }
 0x2b7   : > { %v878_v46 = vpop.f32.mrf.mxu2 }
 0x2b8   : > { %v879_v30 = vadd.f32 %v878_v46, %v1709_v5  ;;  %v907_v0 = vpop.f32.mrf.mxu3 }
 0x2b9   : > { %v908_v42 = vadd.f32 %v907_v0, %v1709_v5  ;;  %v628_v18 = vpop.trf.xlu0 }
 0x2ba   : > { %1317 = vtanh.f32 %v879_v30  ;;  %676 = vst.msk [vmem:[%s1783_s21 + $0x20] sm:$0xff] %vm399_vm2, %v628_v18 }
 0x2bb   : > { %1319 = vtanh.f32 %v908_v42 }
 0x2bf   : > { %v881_v22 = vpop.f32.mrf.mxu2 }
 0x2c0   : > { %v1318_v1 = vpop.eup %1317  ;;  %v882_v3 = vadd.f32 %v881_v22, %v1713_v8  ;;  %v910_v4 = vpop.f32.mrf.mxu3 }
 0x2c1   : > { %v1320_v48 = vpop.eup %1319  ;;  %v927_v5 = vmul.f32 0.5, %v1318_v1  ;;  %v911_v50 = vadd.f32 %v910_v4, %v1713_v8  ;;  %v629_v20 = vpop.trf.xlu0 }
 0x2c2   : > { %v928_v52 = vmul.f32 0.5, %v1320_v48  ;;  %1321 = vtanh.f32 %v882_v3  ;;  %677 = vst.msk [vmem:[%s1783_s21 + $0x28] sm:$0xff] %vm399_vm2, %v629_v20 }
 0x2c3   : > { %1323 = vtanh.f32 %v911_v50  ;;  %v935_v43 = vadd.f32 %v927_v5, %v853_v44 }
 0x2c4   : > { %v936_v45 = vadd.f32 %v928_v52, %v854_v63 }
 0x2c5   : > { %943 = vxpose.xlu2.b32.start [1/4] (short) %v935_v43, 128 }
 0x2c6   : > { %975 = vxpose.xlu0.b32.start [1/4] (short) %v936_v45, 128 }
 0x2c7   : > { %v884_v54 = vpop.f32.mrf.mxu2 }
 0x2c8   : > { %v1322_v56 = vpop.eup %1321  ;;  %v885_v58 = vadd.f32 %v884_v54, %v1719_v17  ;;  %v913_v59 = vpop.f32.mrf.mxu3 }
 0x2c9   : > { %v1324_v61 = vpop.eup %1323  ;;  %v929_v41 = vmul.f32 0.5, %v1322_v56  ;;  %v914_v8 = vadd.f32 %v913_v59, %v1719_v17  ;;  %v630_v21 = vpop.trf.xlu0 }
 0x2ca   : > { %v930_v6 = vmul.f32 0.5, %v1324_v61  ;;  %1325 = vtanh.f32 %v885_v58  ;;  %678 = vst.msk [vmem:[%s1783_s21 + $0x30] sm:$0xff] %vm399_vm2, %v630_v21 }
 0x2cb   : > { %v937_v7 = vadd.f32 %v929_v41, %v855_v19  ;;  %1327 = vtanh.f32 %v914_v8 }
 0x2cc   : > { %v938_v47 = vadd.f32 %v930_v6, %v856_v23 }
 0x2cd   : > { %944 = vxpose.xlu2.b32.cont [2/4] (short) %v937_v7, 128 }
 0x2ce   : > { %976 = vxpose.xlu0.b32.cont [2/4] (short) %v938_v47, 128 }
 0x2cf   : > { %v887_v9 = vpop.f32.mrf.mxu2 }
 0x2d0   : > { %v1326_v34 = vpop.eup %1325  ;;  %v888_v49 = vadd.f32 %v887_v9, %v1725_v36  ;;  %v916_v10 = vpop.f32.mrf.mxu3 }
 0x2d1   : > { %v1328_v11 = vpop.eup %1327  ;;  %v931_v12 = vmul.f32 0.5, %v1326_v34  ;;  %v917_v17 = vadd.f32 %v916_v10, %v1725_v36  ;;  %v631_v24 = vpop.trf.xlu0 }
 0x2d2   : > { %v932_v27 = vmul.f32 0.5, %v1328_v11  ;;  %1329 = vtanh.f32 %v888_v49  ;;  %679 = vst.msk [vmem:[%s1783_s21 + $0x38] sm:$0xff] %vm399_vm2, %v631_v24 }
 0x2d3   : > { %v939_v29 = vadd.f32 %v931_v12, %v1749_v38  ;;  %1331 = vtanh.f32 %v917_v17  ;;  %v657_v38 = vpop.trf.xlu1 }
 0x2d4   : > { %v940_v13 = vadd.f32 %v932_v27, %v1753_v40  ;;  %689 = vst.msk [vmem:[%s1783_s21 + $0x88] sm:$0xff] %vm399_vm2, %v657_v38 }
 0x2d5   : > { %945 = vxpose.xlu2.b32.cont [3/4] (short) %v939_v29, 128 }
 0x2d6   : > { %977 = vxpose.xlu0.b32.cont [3/4] (short) %v940_v13, 128 }
 0x2d8   : > { %v1330_v14 = vpop.eup %1329 }
 0x2d9   : > { %v1332_v60 = vpop.eup %1331  ;;  %v933_v36 = vmul.f32 0.5, %v1330_v14  ;;  %v632_v25 = vpop.trf.xlu0 }
 0x2da   : > { %v934_v15 = vmul.f32 0.5, %v1332_v60  ;;  %680 = vst.msk [vmem:[%s1783_s21 + $0x40] sm:$0xff] %vm399_vm2, %v632_v25 }
 0x2db   : > { %v941_v62 = vadd.f32 %v933_v36, %v1742_v33  ;;  %v658_v39 = vpop.trf.xlu1 }
 0x2dc   : > { %v942_v16 = vadd.f32 %v934_v15, %v1745_v35  ;;  %690 = vst.msk [vmem:[%s1783_s21 + $0x90] sm:$0xff] %vm399_vm2, %v658_v39 }
 0x2dd   : > { %946 = vxpose.xlu2.b32.end [4/4] (short) %v941_v62, 128 }
 0x2de   : > { %978 = vxpose.xlu0.b32.end [4/4] (short) %v942_v16, 128 }
 0x2e1   : > { %v633_v26 = vpop.trf.xlu0 }
 0x2e2   : > { %681 = vst.msk [vmem:[%s1783_s21 + $0x48] sm:$0xff] %vm399_vm2, %v633_v26 }
 0x2e3   : > { %v659_v40 = vpop.trf.xlu1 }
 0x2e4   : > { %691 = vst.msk [vmem:[%s1783_s21 + $0x98] sm:$0xff] %vm399_vm2, %v659_v40 }
 0x2e9   : > { %v634_v28 = vpop.trf.xlu0 }
 0x2ea   : > { %682 = vst.msk [vmem:[%s1783_s21 + $0x50] sm:$0xff] %vm399_vm2, %v634_v28 }
 0x2eb   : > { %v660_v23 = vpop.trf.xlu1 }
 0x2ec   : > { %692 = vst.msk [vmem:[%s1783_s21 + $0xa0] sm:$0xff] %vm399_vm2, %v660_v23 }
 0x2f1   : > { %v635_v31 = vpop.trf.xlu0 }
 0x2f2   : > { %683 = vst.msk [vmem:[%s1783_s21 + $0x58] sm:$0xff] %vm399_vm2, %v635_v31 }
 0x2f3   : > { %v661_v46 = vpop.trf.xlu1 }
 0x2f4   : > { %693 = vst.msk [vmem:[%s1783_s21 + $0xa8] sm:$0xff] %vm399_vm2, %v661_v46 }
 0x2f9   : > { %v636_v33 = vpop.trf.xlu0 }
 0x2fa   : > { %684 = vst.msk [vmem:[%s1783_s21 + $0x60] sm:$0xff] %vm399_vm2, %v636_v33 }
 0x2fb   : > { %v662_v42 = vpop.trf.xlu1 }
 0x2fc   : > { %694 = vst.msk [vmem:[%s1783_s21 + $0xb0] sm:$0xff] %vm399_vm2, %v662_v42 }
 0x301   : > { %v637_v57 = vpop.trf.xlu0 }
 0x302   : > { %685 = vst.msk [vmem:[%s1783_s21 + $0x68] sm:$0xff] %vm399_vm2, %v637_v57 }
 0x303   : > { %v663_v1 = vpop.trf.xlu1 }
 0x304   : > { %695 = vst.msk [vmem:[%s1783_s21 + $0xb8] sm:$0xff] %vm399_vm2, %v663_v1 }
 0x309   : > { %v638_v35 = vpop.trf.xlu0 }
 0x30a   : > { %686 = vst.msk [vmem:[%s1783_s21 + $0x70] sm:$0xff] %vm399_vm2, %v638_v35 }
 0x30b   : > { %v664_v48 = vpop.trf.xlu1 }
 0x30c   : > { %696 = vst.msk [vmem:[%s1783_s21 + $0xc0] sm:$0xff] %vm399_vm2, %v664_v48 }
 0x311   : > { %v639_v37 = vpop.trf.xlu0 }
 0x312   : > { %687 = vst.msk [vmem:[%s1783_s21 + $0x78] sm:$0xff] %vm399_vm2, %v639_v37 }
 0x313   : > { %v665_v52 = vpop.trf.xlu1 }
 0x314   : > { %697 = vst.msk [vmem:[%s1783_s21 + $0xc8] sm:$0xff] %vm399_vm2, %v665_v52 }
 0x31b   : > { %v666_v53 = vpop.trf.xlu1 }
 0x31c   : > { %698 = vst.msk [vmem:[%s1783_s21 + $0xd0] sm:$0xff] %vm399_vm2, %v666_v53 }
 0x323   : > { %v667_v58 = vpop.trf.xlu1 }
 0x324   : > { %699 = vst.msk [vmem:[%s1783_s21 + $0xd8] sm:$0xff] %vm399_vm2, %v667_v58 }
 0x32b   : > { %v668_v41 = vpop.trf.xlu1 }
 0x32c   : > { %700 = vst.msk [vmem:[%s1783_s21 + $0xe0] sm:$0xff] %vm399_vm2, %v668_v41 }
 0x333   : > { %v669_v7 = vpop.trf.xlu1 }
 0x334   : > { %701 = vst.msk [vmem:[%s1783_s21 + $0xe8] sm:$0xff] %vm399_vm2, %v669_v7 }
 0x33b   : > { %v670_v9 = vpop.trf.xlu1 }
 0x33c   : > { %702 = vst.msk [vmem:[%s1783_s21 + $0xf0] sm:$0xff] %vm399_vm2, %v670_v9 }
 0x343   : > { %v671_v10 = vpop.trf.xlu1 }
 0x344   : > { %703 = vst.msk [vmem:[%s1783_s21 + $0xf8] sm:$0xff] %vm399_vm2, %v671_v10 }
 0x35e   : > { %v959_v19 = vpop.trf.xlu2 }
 0x35f   : > { %1177 = vst.msk [vmem:[%s1783_s21 + $0x100] sm:$0xff] %vm399_vm2, %v959_v19 }
 0x366   : > { %v960_v44 = vpop.trf.xlu2 }
 0x367   : > { %1178 = vst.msk [vmem:[%s1783_s21 + $0x108] sm:$0xff] %vm399_vm2, %v960_v44 }
 0x36a   : > { %v991_v63 = vpop.trf.xlu0 }
 0x36b   : > { %1193 = vst.msk [vmem:[%s1783_s21 + $0x180] sm:$0xff] %vm399_vm2, %v991_v63 }
 0x36e   : > { %v961_v30 = vpop.trf.xlu2 }
 0x36f   : > { %1179 = vst.msk [vmem:[%s1783_s21 + $0x110] sm:$0xff] %vm399_vm2, %v961_v30 }
 0x372   : > { %v992_v0 = vpop.trf.xlu0 }
 0x373   : > { %1194 = vst.msk [vmem:[%s1783_s21 + $0x188] sm:$0xff] %vm399_vm2, %v992_v0 }
 0x376   : > { %v962_v55 = vpop.trf.xlu2 }
 0x377   : > { %1180 = vst.msk [vmem:[%s1783_s21 + $0x118] sm:$0xff] %vm399_vm2, %v962_v55 }
 0x37a   : > { %v993_v22 = vpop.trf.xlu0 }
 0x37b   : > { %1195 = vst.msk [vmem:[%s1783_s21 + $0x190] sm:$0xff] %vm399_vm2, %v993_v22 }
 0x37e   : > { %v963_v3 = vpop.trf.xlu2 }
 0x37f   : > { %1181 = vst.msk [vmem:[%s1783_s21 + $0x120] sm:$0xff] %vm399_vm2, %v963_v3 }
 0x382   : > { %v994_v4 = vpop.trf.xlu0 }
 0x383   : > { %1196 = vst.msk [vmem:[%s1783_s21 + $0x198] sm:$0xff] %vm399_vm2, %v994_v4 }
 0x386   : > { %v964_v5 = vpop.trf.xlu2 }
 0x387   : > { %1182 = vst.msk [vmem:[%s1783_s21 + $0x128] sm:$0xff] %vm399_vm2, %v964_v5 }
 0x38a   : > { %v995_v50 = vpop.trf.xlu0 }
 0x38b   : > { %1197 = vst.msk [vmem:[%s1783_s21 + $0x1a0] sm:$0xff] %vm399_vm2, %v995_v50 }
 0x38e   : > { %v965_v43 = vpop.trf.xlu2 }
 0x38f   : > { %1183 = vst.msk [vmem:[%s1783_s21 + $0x130] sm:$0xff] %vm399_vm2, %v965_v43 }
 0x392   : > { %v996_v45 = vpop.trf.xlu0 }
 0x393   : > { %1198 = vst.msk [vmem:[%s1783_s21 + $0x1a8] sm:$0xff] %vm399_vm2, %v996_v45 }
 0x396   : > { %v966_v54 = vpop.trf.xlu2 }
 0x397   : > { %1184 = vst.msk [vmem:[%s1783_s21 + $0x138] sm:$0xff] %vm399_vm2, %v966_v54 }
 0x39a   : > { %v997_v56 = vpop.trf.xlu0 }
 0x39b   : > { %1199 = vst.msk [vmem:[%s1783_s21 + $0x1b0] sm:$0xff] %vm399_vm2, %v997_v56 }
 0x39e   : > { %v967_v59 = vpop.trf.xlu2 }
 0x39f   : > { %1185 = vst.msk [vmem:[%s1783_s21 + $0x140] sm:$0xff] %vm399_vm2, %v967_v59 }
 0x3a2   : > { %v998_v61 = vpop.trf.xlu0 }
 0x3a3   : > { %1200 = vst.msk [vmem:[%s1783_s21 + $0x1b8] sm:$0xff] %vm399_vm2, %v998_v61 }
 0x3a6   : > { %v968_v8 = vpop.trf.xlu2 }
 0x3a7   : > { %1186 = vst.msk [vmem:[%s1783_s21 + $0x148] sm:$0xff] %vm399_vm2, %v968_v8 }
 0x3aa   : > { %v999_v6 = vpop.trf.xlu0 }
 0x3ab   : > { %1201 = vst.msk [vmem:[%s1783_s21 + $0x1c0] sm:$0xff] %vm399_vm2, %v999_v6 }
 0x3ae   : > { %v969_v47 = vpop.trf.xlu2 }
 0x3af   : > { %1187 = vst.msk [vmem:[%s1783_s21 + $0x150] sm:$0xff] %vm399_vm2, %v969_v47 }
 0x3b2   : > { %v1000_v32 = vpop.trf.xlu0 }
 0x3b3   : > { %1202 = vst.msk [vmem:[%s1783_s21 + $0x1c8] sm:$0xff] %vm399_vm2, %v1000_v32 }
 0x3b6   : > { %v970_v34 = vpop.trf.xlu2 }
 0x3b7   : > { %1188 = vst.msk [vmem:[%s1783_s21 + $0x158] sm:$0xff] %vm399_vm2, %v970_v34 }
 0x3ba   : > { %v1001_v49 = vpop.trf.xlu0 }
 0x3bb   : > { %1203 = vst.msk [vmem:[%s1783_s21 + $0x1d0] sm:$0xff] %vm399_vm2, %v1001_v49 }
 0x3be   : > { %v971_v11 = vpop.trf.xlu2 }
 0x3bf   : > { %1189 = vst.msk [vmem:[%s1783_s21 + $0x160] sm:$0xff] %vm399_vm2, %v971_v11 }
 0x3c2   : > { %v1002_v12 = vpop.trf.xlu0 }
 0x3c3   : > { %1204 = vst.msk [vmem:[%s1783_s21 + $0x1d8] sm:$0xff] %vm399_vm2, %v1002_v12 }
 0x3c6   : > { %v972_v17 = vpop.trf.xlu2 }
 0x3c7   : > { %1190 = vst.msk [vmem:[%s1783_s21 + $0x168] sm:$0xff] %vm399_vm2, %v972_v17 }
 0x3ca   : > { %v1003_v27 = vpop.trf.xlu0 }
 0x3cb   : > { %1205 = vst.msk [vmem:[%s1783_s21 + $0x1e0] sm:$0xff] %vm399_vm2, %v1003_v27 }
 0x3ce   : > { %v973_v29 = vpop.trf.xlu2 }
 0x3cf   : > { %1191 = vst.msk [vmem:[%s1783_s21 + $0x170] sm:$0xff] %vm399_vm2, %v973_v29 }
 0x3d2   : > { %v1004_v13 = vpop.trf.xlu0 }
 0x3d3   : > { %1206 = vst.msk [vmem:[%s1783_s21 + $0x1e8] sm:$0xff] %vm399_vm2, %v1004_v13 }
 0x3d6   : > { %v974_v51 = vpop.trf.xlu2 }
 0x3d7   : > { %1192 = vst.msk [vmem:[%s1783_s21 + $0x178] sm:$0xff] %vm399_vm2, %v974_v51 }
 0x3da   : > { %v1005_v14 = vpop.trf.xlu0 }
 0x3db   : > { %1207 = vst.msk [vmem:[%s1783_s21 + $0x1f0] sm:$0xff] %vm399_vm2, %v1005_v14 }
 0x3e2   : > { %v1006_v60 = vpop.trf.xlu0 }
 0x3e3   : > { %1208 = vst.msk [vmem:[%s1783_s21 + $0x1f8] sm:$0xff] %vm399_vm2, %v1006_v60 }
 0x3e4 PF: > { %s16_s18 = sadd.s32 1, %s1373_s18  }
 0x3e5   : > { %p13_p8 = scmp.ge.s32.totalorder %s16_s18, 6  }
 0x3e7   :  { %15 = sbr.rel (!%p13_p8) target bundleno = 1 (0x1), region = 79 }
 0x3ec   :  { %1062 = vsyncpa [#allocation3], 1 }
 0x3ed   :  { %1064 = vsyncpa [#allocation3 + $0x1], 1 }

</bundles_post_ra>
